<compile_context>
chip_gen: v5e
topology: v5e:2x2
jax: 0.10.0
libtpu: 0.0.40
codegen_flags: <defaults>
</compile_context>

<pallas_src>
import jax
import jax.numpy as jnp
from jax.experimental import pallas as pl
from jax.experimental.pallas import tpu as pltpu


def _round_up(x, m):
    return ((x + m - 1) // m) * m


def _gemm_bn_silu_kernel(a_ref, b_ref, scale_ref, shift_ref, o_ref, acc_ref):
    """One (tm, tn) output tile of  SiLU(A @ B * scale + shift).

    a_ref:     (tm, tk)  bf16   im2col activation tile
    b_ref:     (tk, tn)  bf16   weight tile
    scale_ref: (1, tn)   f32    folded BN scale  = gamma / sqrt(var+eps)
    shift_ref: (1, tn)   f32    folded BN shift  = beta - mean*scale
    o_ref:     (tm, tn)  f32    output tile
    acc_ref:   (tm, tn)  f32    VMEM accumulator scratch
    """
    k = pl.program_id(2)

    @pl.when(k == 0)
    def _():
        acc_ref[...] = jnp.zeros_like(acc_ref)

    acc_ref[...] += jnp.dot(a_ref[...], b_ref[...],
                            preferred_element_type=jnp.float32)

    @pl.when(k == pl.num_programs(2) - 1)
    def _():
        y = acc_ref[...] * scale_ref[...] + shift_ref[...]   # folded BatchNorm
        y = y * jax.nn.sigmoid(y)                            # SiLU
        o_ref[...] = y.astype(o_ref.dtype)


def make_conv_bn_silu(N, H, W, C1, C2, K, s=1, p=None):
    """Builds a callable implementing Conv(c1, c2, k, s).forward (eval mode)."""
    pad = (K // 2) if p is None else p                 # autopad (handles even K)
    H_out = (H + 2 * pad - K) // s + 1
    W_out = (W + 2 * pad - K) // s + 1

    M = N * H_out * W_out
    KC = K * K * C1

    # Lane-dense / MXU-friendly padded sizes.
    KC_pad = _round_up(KC, 128)
    C2_pad = _round_up(C2, 128)
    tm = min(256, _round_up(M, 8))
    tn = min(256, C2_pad)
    tk = min(512, KC_pad)
    M_pad = _round_up(M, tm)

    grid = (M_pad // tm, C2_pad // tn, KC_pad // tk)

    # Explicit VMEM budget: double-buffered inputs/outputs + f32 accumulator.
    block_bytes = (2 * tm * tk * 2          # A tiles (bf16, 2 buffers)
                   + 2 * tk * tn * 2        # B tiles (bf16, 2 buffers)
                   + 2 * tm * tn * 4        # out tiles (f32, 2 buffers)
                   + tm * tn * 4            # accumulator scratch
                   + 4 * tn * 4)            # scale/shift tiles
    vmem_limit = int(min(max(4 * block_bytes, 8 << 20), 32 << 20))

    cost = pl.CostEstimate(
        flops=2 * M_pad * KC_pad * C2_pad,
        transcendentals=M_pad * C2_pad,
        bytes_accessed=(M_pad * KC_pad * 2 + KC_pad * C2_pad * 2
                        + M_pad * C2_pad * 4 + 2 * C2_pad * 4))

    gemm = pl.pallas_call(
        _gemm_bn_silu_kernel,
        out_shape=jax.ShapeDtypeStruct((M_pad, C2_pad), jnp.float32),
        grid_spec=pltpu.PrefetchScalarGridSpec(
            num_scalar_prefetch=0,
            grid=grid,
            in_specs=[
                pl.BlockSpec((tm, tk), lambda i, j, k: (i, k)),
                pl.BlockSpec((tk, tn), lambda i, j, k: (k, j)),
                pl.BlockSpec((1, tn), lambda i, j, k: (0, j)),
                pl.BlockSpec((1, tn), lambda i, j, k: (0, j)),
            ],
            out_specs=pl.BlockSpec((tm, tn), lambda i, j, k: (i, j)),
            scratch_shapes=[pltpu.VMEM((tm, tn), jnp.float32)],
        ),
        compiler_params=pltpu.CompilerParams(
            dimension_semantics=("parallel", "parallel", "arbitrary"),
            vmem_limit_bytes=vmem_limit),
        cost_estimate=cost,
    )

    def run(x_nchw, w_oihw, gamma, beta, run_mean, run_var, eps=1e-5):
        # ---- layout + im2col glue (plain JAX) ----
        # TODO(synk): in a full network keep NHWC end-to-end and fold the
        # im2col / spatial padding into the Pallas path to avoid these extra
        # HBM round trips; here we keep the PyTorch-facing NCHW interface.
        x = jnp.transpose(x_nchw, (0, 2, 3, 1))                      # NHWC
        x = jnp.pad(x, ((0, 0), (pad, pad), (pad, pad), (0, 0)))     # spatial pad
        taps = []
        for kh in range(K):
            for kw in range(K):
                taps.append(x[:, kh:kh + (H_out - 1) * s + 1:s,
                              kw:kw + (W_out - 1) * s + 1:s, :])
        patches = jnp.concatenate(taps, axis=-1)                     # (N,Ho,Wo,K*K*C1)
        a = patches.reshape(M, KC).astype(jnp.bfloat16)
        a = jnp.pad(a, ((0, M_pad - M), (0, KC_pad - KC)))

        # weight (O,I,Kh,Kw) -> (Kh,Kw,I,O) -> (K*K*C1, C2); tap order matches.
        w = jnp.transpose(w_oihw, (2, 3, 1, 0)).reshape(KC, C2)
        w = jnp.pad(w.astype(jnp.bfloat16),
                    ((0, KC_pad - KC), (0, C2_pad - C2)))

        inv_std = 1.0 / jnp.sqrt(run_var.astype(jnp.float32) + eps)
        scale = (gamma * inv_std).astype(jnp.float32)
        shift = (beta - run_mean * gamma * inv_std).astype(jnp.float32)
        scale = jnp.pad(scale, (0, C2_pad - C2)).reshape(1, C2_pad)
        shift = jnp.pad(shift, (0, C2_pad - C2)).reshape(1, C2_pad)

        y = gemm(a, w, scale, shift)                                 # (M_pad, C2_pad) f32
        y = y[:M, :C2].reshape(N, H_out, W_out, C2)
        return jnp.transpose(y, (0, 3, 1, 2)).astype(x_nchw.dtype)   # NCHW

    return run


if __name__ == "__main__":
    # Small shapes consistent with Conv(c1=4, c2=8, k=3, s=1): x = (2, 4, 16, 16)
    N, C1, C2, H, W, K = 2, 4, 8, 16, 16, 3
    pad = K // 2

    key = jax.random.PRNGKey(0)
    kx, kw, kg, kb, km, kv = jax.random.split(key, 6)

    x = jax.random.normal(kx, (N, C1, H, W), dtype=jnp.float32)
    w = jax.random.normal(kw, (C2, C1, K, K), dtype=jnp.float32) * 0.1
    gamma = 1.0 + 0.1 * jax.random.normal(kg, (C2,), dtype=jnp.float32)
    beta = 0.1 * jax.random.normal(kb, (C2,), dtype=jnp.float32)
    run_mean = 0.1 * jax.random.normal(km, (C2,), dtype=jnp.float32)
    run_var = 0.5 + jnp.abs(jax.random.normal(kv, (C2,), dtype=jnp.float32))

    conv_bn_silu = make_conv_bn_silu(N, H, W, C1, C2, K)
    out = conv_bn_silu(x, w, gamma, beta, run_mean, run_var)
    out = jax.block_until_ready(out)

    # Pure-JAX reference: same bf16 operand rounding, f32 conv accumulation,
    # eval-mode BatchNorm2d + SiLU in f32 (matches kernel numerics).
    eps = 1e-5
    xb = x.astype(jnp.bfloat16).astype(jnp.float32)
    wb = w.astype(jnp.bfloat16).astype(jnp.float32)
    ref_conv = jax.lax.conv_general_dilated(
        xb, wb, window_strides=(1, 1), padding=[(pad, pad), (pad, pad)],
        dimension_numbers=("NCHW", "OIHW", "NCHW"),
        precision=jax.lax.Precision.HIGHEST)
    scale = (gamma / jnp.sqrt(run_var + eps)).reshape(1, C2, 1, 1)
    shift = (beta - run_mean * gamma / jnp.sqrt(run_var + eps)).reshape(1, C2, 1, 1)
    ref = ref_conv * scale + shift
    ref = ref * jax.nn.sigmoid(ref)

    assert out.shape == (N, C2, H, W)
    max_err = jnp.max(jnp.abs(out - ref))
    assert jnp.allclose(out, ref, atol=2e-3, rtol=2e-3), (
        f"max abs err = {max_err}")

    # TODO(synk): PyTorch BatchNorm2d in training mode uses per-batch statistics;
    # this kernel implements the inference (running-stats) path only.
    print("KERNEL_OK")
</pallas_src>

<mosaic_0001>
module attributes {stable_mosaic.version = 11 : i64} {
  func.func @_gemm_bn_silu_kernel(%arg0: i32, %arg1: i32, %arg2: i32, %arg3: memref<256x128xbf16, #tpu.memory_space<vmem>>, %arg4: memref<128x128xbf16, #tpu.memory_space<vmem>>, %arg5: memref<1x128xf32, #tpu.memory_space<vmem>>, %arg6: memref<1x128xf32, #tpu.memory_space<vmem>>, %arg7: memref<256x128xf32, #tpu.memory_space<vmem>>, %arg8: memref<256x128xf32, #tpu.memory_space<vmem>>) attributes {dimension_semantics = [#tpu.dimension_semantics<parallel>, #tpu.dimension_semantics<parallel>, #tpu.dimension_semantics<arbitrary>], iteration_bounds = array<i64: 2, 1, 1>, scalar_prefetch = 0 : i64, scratch_operands = 1 : i64, tpu.core_type = #tpu.core_type<tc>, window_params = [{transform_indices = @transform_0, window_bounds = array<i64: 256, 128>}, {transform_indices = @transform_1, window_bounds = array<i64: 128, 128>}, {transform_indices = @transform_2, window_bounds = array<i64: 1, 128>}, {transform_indices = @transform_3, window_bounds = array<i64: 1, 128>}, {transform_indices = @transform_4, window_bounds = array<i64: 256, 128>}]} {
    %c0_i32 = arith.constant 0 : i32
    %0 = arith.cmpi eq, %arg2, %c0_i32 : i32
    %1 = arith.extui %0 : i1 to i32
    %c0_i32_0 = arith.constant 0 : i32
    %2 = arith.cmpi ne, %1, %c0_i32_0 : i32
    scf.if %2 {
      %cst_10 = arith.constant 0.000000e+00 : f32
      %12 = vector.broadcast %cst_10 : f32 to vector<256x128xf32>
      %c0_11 = arith.constant 0 : index
      %c0_12 = arith.constant 0 : index
      %13 = vector.load %arg8[%c0_11, %c0_12] : memref<256x128xf32, #tpu.memory_space<vmem>>, vector<256x128xf32>
      tpu.vector_store %arg8[%c0_11, %c0_12], %12 {strides = array<i32>} : memref<256x128xf32, #tpu.memory_space<vmem>>, vector<256x128xf32>,
    } else {
    }
    %c0 = arith.constant 0 : index
    %c0_1 = arith.constant 0 : index
    %3 = vector.load %arg8[%c0, %c0_1] : memref<256x128xf32, #tpu.memory_space<vmem>>, vector<256x128xf32>
    %c0_2 = arith.constant 0 : index
    %c0_3 = arith.constant 0 : index
    %4 = vector.load %arg3[%c0_2, %c0_3] : memref<256x128xbf16, #tpu.memory_space<vmem>>, vector<256x128xbf16>
    %c0_4 = arith.constant 0 : index
    %c0_5 = arith.constant 0 : index
    %5 = vector.load %arg4[%c0_4, %c0_5] : memref<128x128xbf16, #tpu.memory_space<vmem>>, vector<128x128xbf16>
    %cst = arith.constant dense<0.000000e+00> : vector<256x128xf32>
    %6 = tpu.matmul %4, %5, %cst {dimension_numbers = #tpu.dot_dimension_numbers<[1], [0], [0], [1], [0, 0, 1, 1], [], []>} : vector<256x128xbf16>, vector<128x128xbf16>, vector<256x128xf32> -> vector<256x128xf32>
    %7 = arith.addf %3, %6 : vector<256x128xf32>
    %c0_6 = arith.constant 0 : index
    %c0_7 = arith.constant 0 : index
    %8 = vector.load %arg8[%c0_6, %c0_7] : memref<256x128xf32, #tpu.memory_space<vmem>>, vector<256x128xf32>
    tpu.vector_store %arg8[%c0_6, %c0_7], %7 {strides = array<i32>} : memref<256x128xf32, #tpu.memory_space<vmem>>, vector<256x128xf32>,
    %c0_i32_8 = arith.constant 0 : i32
    %9 = arith.cmpi eq, %arg2, %c0_i32_8 : i32
    %10 = arith.extui %9 : i1 to i32
    %c0_i32_9 = arith.constant 0 : i32
    %11 = arith.cmpi ne, %10, %c0_i32_9 : i32
    scf.if %11 {
      %c0_10 = arith.constant 0 : index
      %c0_11 = arith.constant 0 : index
      %12 = vector.load %arg8[%c0_10, %c0_11] : memref<256x128xf32, #tpu.memory_space<vmem>>, vector<256x128xf32>
      %c0_12 = arith.constant 0 : index
      %c0_13 = arith.constant 0 : index
      %13 = vector.load %arg5[%c0_12, %c0_13] : memref<1x128xf32, #tpu.memory_space<vmem>>, vector<1x128xf32>
      %14 = vector.broadcast %13 : vector<1x128xf32> to vector<256x128xf32>
      %15 = arith.mulf %12, %14 : vector<256x128xf32>
      %c0_14 = arith.constant 0 : index
      %c0_15 = arith.constant 0 : index
      %16 = vector.load %arg6[%c0_14, %c0_15] : memref<1x128xf32, #tpu.memory_space<vmem>>, vector<1x128xf32>
      %17 = vector.broadcast %16 : vector<1x128xf32> to vector<256x128xf32>
      %18 = arith.addf %15, %17 : vector<256x128xf32>
      %19 = arith.negf %18 : vector<256x128xf32>
      %20 = math.exp %19 : vector<256x128xf32>
      %cst_16 = arith.constant 1.000000e+00 : f32
      %21 = vector.broadcast %cst_16 : f32 to vector<256x128xf32>
      %22 = arith.addf %21, %20 : vector<256x128xf32>
      %23 = arith.divf %21, %22 : vector<256x128xf32>
      %24 = arith.mulf %18, %23 : vector<256x128xf32>
      %c0_17 = arith.constant 0 : index
      %c0_18 = arith.constant 0 : index
      %25 = vector.load %arg7[%c0_17, %c0_18] : memref<256x128xf32, #tpu.memory_space<vmem>>, vector<256x128xf32>
      tpu.vector_store %arg7[%c0_17, %c0_18], %24 {strides = array<i32>} : memref<256x128xf32, #tpu.memory_space<vmem>>, vector<256x128xf32>,
    } else {
    }
    return
  }
  func.func @transform_0(%arg0: i32, %arg1: i32, %arg2: i32) -> (i32, i32) {
    %c0_i32 = arith.constant 0 : i32
    return %arg0, %arg2 : i32, i32
  }
  func.func @transform_1(%arg0: i32, %arg1: i32, %arg2: i32) -> (i32, i32) {
    %c0_i32 = arith.constant 0 : i32
    return %arg2, %arg1 : i32, i32
  }
  func.func @transform_2(%arg0: i32, %arg1: i32, %arg2: i32) -> (i32, i32) {
    %c0_i32 = arith.constant 0 : i32
    %c0_i32_0 = arith.constant 0 : i32
    return %c0_i32, %arg1 : i32, i32
  }
  func.func @transform_3(%arg0: i32, %arg1: i32, %arg2: i32) -> (i32, i32) {
    %c0_i32 = arith.constant 0 : i32
    %c0_i32_0 = arith.constant 0 : i32
    return %c0_i32, %arg1 : i32, i32
  }
  func.func @transform_4(%arg0: i32, %arg1: i32, %arg2: i32) -> (i32, i32) {
    %c0_i32 = arith.constant 0 : i32
    return %arg0, %arg1 : i32, i32
  }
}

</mosaic_0001>

<bundles_post_ra>
// kernel: tpu_custom_call.1
= control target key start
LH: loop header
LB: loop body
LE: loop exit
PB: predicated region body
PF: predicated region fallthrough
CT: control target
= control target key end

     0   :  { %s3063_s0 = inlined_call_operand.hbm [shape: bf16[512,128], index: 0, kind: input, shape index: {}]   ;;  %s3064_s1 = inlined_call_operand.hbm [shape: bf16[128,128], index: 1, kind: input, shape index: {}]   ;;  %s3065_s2 = inlined_call_operand.vmem [shape: f32[1,128], index: 2, kind: input, shape index: {}]   ;;  %s3066_s3 = inlined_call_operand.vmem [shape: f32[1,128], index: 3, kind: input, shape index: {}]   ;;  %s3067_s4 = inlined_call_operand.hbm [shape: f32[512,128], index: 4, kind: output, shape index: {}]  }
   0x1   :  { %3071 = sst [smem:[#allocation13_spill]] %s3064_s1 }
   0x2   :  { %9 = vsyncpa [#allocation4], 0 }
   0x3   :  { %11 = vsyncpa [#allocation4 + $0x1], 0 }
   0x4   :  { %12 = vsyncpa [#allocation7], 0 }
   0x5   :  { %13 = vsyncpa [#allocation5], 0 }
   0x6   :  { %15 = vsyncpa [#allocation5 + $0x1], 0  ;;  %s2220_s15 = smov 0   ;;  %s2222_s16 = smov 0  }
   0x7   :  { %s2224_s17 = smov 0   ;;  %s2226_s18 = smov 0  }
   0x8   :  { %s2228_s19 = smov 0   ;;  %s2230_s20 = smov 0  }
   0x9 LB: > { %s1636_s21 = sadd.s32 4294967295, %s2188_s20   ;;  %s1637_s22 = sadd.s32 4294967294, %s2188_s20   ;;  %s2188_s20 = sphi %s2230_s20, %s21_s20   ;;  %s2184_s19 = sphi %s2228_s19, %s3134_s19   ;;  %s2180_s18 = sphi %s2226_s18, %s3133_s18   ;;  %s2176_s17 = sphi %s2224_s17, %s3132_s17   ;;  %s2172_s16 = sphi %s2222_s16, %s3131_s16   ;;  %s2168_s15 = sphi %s2220_s15, %s3130_s15  }
   0xa   : > { %p62_p0 = scmp.ne.s32.totalorder %s2172_s16, %s2168_s15  ;;  %p2254_p1 = scmp.eq.s32.totalorder %s1636_s21, 0 }
   0xb   : > { %p2258_p2 = scmp.eq.s32.totalorder %s1636_s21, 1  ;;  %p174_p3 = scmp.eq.s32.totalorder %s1637_s22, 1 }
   0xc   : > { %p2264_p4 = por %p2254_p1, %p62_p0  ;;  %p1638_p5 = scmp.ge.s32.totalorder %s2188_s20, 1 }
   0xd   : > { %p2269_p6 = por %p174_p3, %p62_p0  ;;  %p181_p7 = scmp.lt.s32.totalorder %s2188_s20, 3 }
   0xe   : > { %s3076_s1 = sld [smem:[#allocation13_spill]]  ;;  %s2190_s5 = smov [#allocation6]  }
   0xf   : > { %p2277_p8 = pnand %p1638_p5, %p181_p7  ;;  %s198_s6 = sshll.u32 %s2190_s5, 4  ;;  %s199_s6 = int_to_ptr.vmem [resolvable:$true] %s198_s6 }
  0x10   : > { %p1642_p11 = scmp.ge.s32.totalorder %s2188_s20, 2  ;;  %s3068_s7 = smov 64  }
  0x11   : > { %p1841_p9 = pneg %p2277_p8  ;;  %s3069_s8 = smov 4  }
  0x12   : > { %s40_s9 = sadd.s32 1, %s2184_s19  ;;  %s49_s10 = sadd.s32 1, %s2176_s17 }
  0x13   : > { %p1842_p10 = pnand %p1841_p9, %p2254_p1  ;;  %p42_p12 = scmp.ge.s32.totalorder %s40_s9, 2 }
  0x14   : > { %s196_s29 = sshll.u32 %s3076_s1, 4  ;;  %p56_p13 = scmp.ne.s32.totalorder %s2176_s17, %s2172_s16  ;;  %s197_s29 = int_to_ptr.hbm [resolvable:$true] %s196_s29 }
  0x15   : > { %1844 = dma.hbm_to_vmem [thread:$0]  (!%p1842_p10), %s197_s29, 1024, %s199_s6, [#allocation7], %s3068_s7, %s3068_s7, %s3069_s8  }
  0x16   : > { %p57_p0 = scmp.eq.s32.totalorder %s2188_s20, 0  ;;  %s3136_s9 = smov (%p42_p12, %s40_s9), 0 }
  0x17   : > { %3078 = sst [smem:[#allocation12_spill]] %s3136_s9  ;;  %p2302_p5 = por %p2258_p2, %p56_p13 }
  0x18   : > { %p2296_p3 = por %p57_p0, %p56_p13  ;;  %s44_s13 = ssub.s32 %s2184_s19, %s3136_s9 }
  0x19   : > { %p1854_p7 = scmp.lt.s32.totalorder %s2188_s20, 2  ;;  %p47_p9 = scmp.eq.s32.totalorder %s44_s13, 0 }
  0x1a   : > { %s224_s14 = sand.u32 1, %s2176_s17   ;;  %s1783_s27 = sshll.u32 %s2184_s19, 7 }
  0x1b   : > { %s1643_s21 = sshll.u32 %s224_s14, 7  ;;  %s234_s5 = scalar_lea.hbm %s3063_s0, %s1783_s27 }
  0x1c   : > { %s2311_s22 = scalar_select %p47_p9, %s2176_s17, %s49_s10  }
  0x1d   : > { %s228_s6 = scalar_lea.vmem [#allocation3], %s1643_s21  ;;  %s235_s24 = sshll.u32 %s234_s5, 4  ;;  %s236_s24 = int_to_ptr.hbm [resolvable:$true] %s235_s24 }
  0x1e   : > { %s237_s7 = sshll.u32 %s228_s6, 4  ;;  %p1846_p2 = pnand %p1854_p7, %p2296_p3  ;;  %s238_s7 = int_to_ptr.vmem [resolvable:$true] %s237_s7 }
  0x1f   : > { %s225_s8 = scalar_lea.sflag [#allocation4], %s224_s14  ;;  %s3081_s1 = smov 4  }
  0x20   : > { %s3082_s9 = smov 64   ;;  %249 = sbr.rel (%p2277_p8) target bundleno = 374 (0x176), region = 36 }
  0x21   : > { %1848 = dma.hbm_to_vmem [thread:$0]  (!%p1846_p2), %s236_s24, 2048, %s238_s7, %s225_s8, %s3082_s9, %s3082_s9, %s3081_s1  }
  0x22   : > { %s2325_s10 = sand.u32 (!%p2277_p8), 1, %s2172_s16  }
  0x23   : > { %s1647_s13 = sshll.u32 (!%p2277_p8), %s2325_s10, 7  ;;  %s252_s21 = scalar_lea.sflag (!%p2277_p8), [#allocation4], %s2325_s10 }
  0x24   : > { %s2329_s27 = scalar_lea.vmem (!%p2277_p8), [#allocation3], %s1647_s13 }
  0x25   : > { %2155 = dma.done.wait (%p2264_p4), %s252_s21, 2048  }
  0x26   : > { %2157 = vsyncadd (%p2264_p4), %s252_s21, 4294965248 }
  0x27   : > { %2159 = dma.done.wait (%p2254_p1), [#allocation7], 1024  }
  0x28   : > { %2161 = vsyncadd (%p2254_p1), [#allocation7], 4294966272  ;;  %v1807_v0 = vld [vmem:[#allocation6 + $0x38] sm:$0xff]  ;;  %v1806_v1 = vld [vmem:[#allocation6 + $0x30] sm:$0xff]  ;;  %s1649_s7 = sshll.u32 %s2325_s10, 8  ;;  %s1808_s29 = sshll.u32 %s2180_s18, 8 }
  0x29   : > { %561 = vmatpush.bf16.msra.mxu0 %v1807_v0  ;;  %1809 = vmatpush.bf16.msra.mxu1 %v1807_v0  ;;  %v1805_v2 = vld [vmem:[#allocation6 + $0x28] sm:$0xff]  ;;  %v1804_v3 = vld [vmem:[#allocation6 + $0x20] sm:$0xff]  ;;  %v1803_v4 = vld [vmem:[#allocation6 + $0x18] sm:$0xff]  ;;  %s2479_s8 = scalar_lea.vmem [#allocation8], %s1649_s7  ;;  %s1506_s24 = scalar_lea.hbm %s3067_s4, %s1808_s29 }
  0x2a   : > { %1810 = vmatpush.bf16.msra.mxu2 %v1807_v0  ;;  %1811 = vmatpush.bf16.msra.mxu3 %v1807_v0  ;;  %v1802_v5 = vld [vmem:[#allocation6 + $0x10] sm:$0xff]  ;;  %v1801_v6 = vld [vmem:[#allocation6 + $0x8] sm:$0xff]  ;;  %v1800_v7 = vld [vmem:[#allocation6] sm:$0xff]  ;;  %s1507_s13 = sshll.u32 %s2479_s8, 4  ;;  %s1509_s18 = sshll.u32 %s1506_s24, 4  ;;  %s1508_s13 = int_to_ptr.vmem [resolvable:$true] %s1507_s13  ;;  %s1510_s18 = int_to_ptr.hbm [resolvable:$true] %s1509_s18 }
  0x2b   : > { %v1784_v8 = vld [vmem:[%s2329_s27] sm:$0xff]  ;;  %v1785_v12 = vld [vmem:[%s2329_s27 + $0x8] sm:$0xff]  ;;  %v1786_v16 = vld [vmem:[%s2329_s27 + $0x10] sm:$0xff]  ;;  %s1494_s21 = scalar_lea.sflag [#allocation5], %s2325_s10  ;;  %s2122_s30 = scalar_lea.hbm %s3067_s4, 512 }
  0x2c   : > { %v1788_v9 = vld [vmem:[%s2329_s27 + $0x20] sm:$0xff]  ;;  %v1789_v13 = vld [vmem:[%s2329_s27 + $0x28] sm:$0xff]  ;;  %v1790_v17 = vld [vmem:[%s2329_s27 + $0x30] sm:$0xff] }
  0x2d   : > { %562 = vmatpush.bf16.msra.mxu0 %v1806_v1  ;;  %1812 = vmatpush.bf16.msra.mxu1 %v1806_v1  ;;  %v1792_v10 = vld [vmem:[%s2329_s27 + $0x40] sm:$0xff]  ;;  %v1793_v14 = vld [vmem:[%s2329_s27 + $0x48] sm:$0xff]  ;;  %v1794_v18 = vld [vmem:[%s2329_s27 + $0x50] sm:$0xff] }
  0x2e   : > { %1813 = vmatpush.bf16.msra.mxu2 %v1806_v1  ;;  %1814 = vmatpush.bf16.msra.mxu3 %v1806_v1  ;;  %v1796_v11 = vld [vmem:[%s2329_s27 + $0x60] sm:$0xff]  ;;  %v1797_v15 = vld [vmem:[%s2329_s27 + $0x68] sm:$0xff]  ;;  %v1798_v19 = vld [vmem:[%s2329_s27 + $0x70] sm:$0xff] }
  0x2f   : > { %v1787_v20 = vld [vmem:[%s2329_s27 + $0x18] sm:$0xff]  ;;  %v2358_v24 = vld [vmem:[%s3065_s2] ss:$0 sm:$0xff] }
  0x30   : > { %v1791_v21 = vld [vmem:[%s2329_s27 + $0x38] sm:$0xff]  ;;  %v2363_v25 = vld [vmem:[%s3066_s3] ss:$0 sm:$0xff] }
  0x31   : > { %563 = vmatpush.bf16.msra.mxu0 %v1805_v2  ;;  %1815 = vmatpush.bf16.msra.mxu1 %v1805_v2  ;;  %v1795_v22 = vld [vmem:[%s2329_s27 + $0x58] sm:$0xff] }
  0x32   : > { %1816 = vmatpush.bf16.msra.mxu2 %v1805_v2  ;;  %1817 = vmatpush.bf16.msra.mxu3 %v1805_v2  ;;  %v1799_v23 = vld [vmem:[%s2329_s27 + $0x78] sm:$0xff]  ;;  %s2116_s27 = sshra.s32 %s1510_s18, 4  ;;  %s2117_s27 = int_to_ptr.hbm [resolvable:$true] %s2116_s27 }
  0x33   : > { %s2118_s1 = scalar_lea.hbm %s2117_s27, 256  ;;  %p2123_p10 = scmp.lt.s32.totalorder %s2117_s27, %s3067_s4 }
  0x34   : > { %p2119_p1 = scmp.ne.s32.totalorder %s2117_s27, %s2118_s1  ;;  %p2124_p12 = scmp.lt.s32.totalorder %s2122_s30, %s2118_s1 }
  0x35   : > { %564 = vmatpush.bf16.msra.mxu0 %v1804_v3  ;;  %1818 = vmatpush.bf16.msra.mxu1 %v1804_v3 }
  0x36   : > { %1819 = vmatpush.bf16.msra.mxu2 %v1804_v3  ;;  %1820 = vmatpush.bf16.msra.mxu3 %v1804_v3  ;;  %p2120_p4 = pnand %p2119_p1, %p2302_p5  ;;  %p2125_p13 = por %p2124_p12, %p2123_p10 }
  0x38   : > { %p2121_p8 = pneg %p2120_p4 }
  0x39   : > { %565 = vmatpush.bf16.msra.mxu0 %v1803_v4  ;;  %1821 = vmatpush.bf16.msra.mxu1 %v1803_v4 }
  0x3a   : > { %1822 = vmatpush.bf16.msra.mxu2 %v1803_v4  ;;  %1823 = vmatpush.bf16.msra.mxu3 %v1803_v4  ;;  %p2126_p0 = pnand %p2125_p13, %p2121_p8 }
  0x3d   : > { %566 = vmatpush.bf16.msra.mxu0 %v1802_v5  ;;  %1824 = vmatpush.bf16.msra.mxu1 %v1802_v5 }
  0x3e   : > { %1825 = vmatpush.bf16.msra.mxu2 %v1802_v5  ;;  %1826 = vmatpush.bf16.msra.mxu3 %v1802_v5 }
  0x41   : > { %567 = vmatpush.bf16.msra.mxu0 %v1801_v6  ;;  %1827 = vmatpush.bf16.msra.mxu1 %v1801_v6 }
  0x42   : > { %1828 = vmatpush.bf16.msra.mxu2 %v1801_v6  ;;  %1829 = vmatpush.bf16.msra.mxu3 %v1801_v6 }
  0x45   : > { %568 = vmatpush.bf16.msra.mxu0 %v1800_v7  ;;  %1830 = vmatpush.bf16.msra.mxu1 %v1800_v7 }
  0x46   : > { %1831 = vmatpush.bf16.msra.mxu2 %v1800_v7  ;;  %1832 = vmatpush.bf16.msra.mxu3 %v1800_v7 }
  0x48   : > { %569 = vmatmul.bf16.vlgmr.msra.gmra.mxu0 %v1784_v8  ;;  %589 = vmatmul.bf16.vlgmr.msra.gmra.mxu1 %v1788_v9 }
  0x49   : > { %609 = vmatmul.bf16.vlgmr.msra.gmra.mxu2 %v1792_v10  ;;  %629 = vmatmul.bf16.vlgmr.msra.gmra.mxu3 %v1796_v11 }
  0x58   : > { %574 = vmatmul.bf16.gmra.mxu0 %v1785_v12  ;;  %594 = vmatmul.bf16.gmra.mxu1 %v1789_v13 }
  0x59   : > { %614 = vmatmul.bf16.gmra.mxu2 %v1793_v14  ;;  %634 = vmatmul.bf16.gmra.mxu3 %v1797_v15 }
  0x68   : > { %579 = vmatmul.bf16.gmra.mxu0 %v1786_v16  ;;  %599 = vmatmul.bf16.gmra.mxu1 %v1790_v17 }
  0x69   : > { %619 = vmatmul.bf16.gmra.mxu2 %v1794_v18  ;;  %639 = vmatmul.bf16.gmra.mxu3 %v1798_v19 }
  0x78   : > { %584 = vmatmul.bf16.gmra.mxu0 %v1787_v20  ;;  %604 = vmatmul.bf16.gmra.mxu1 %v1791_v21 }
  0x79   : > { %624 = vmatmul.bf16.gmra.mxu2 %v1795_v22  ;;  %644 = vmatmul.bf16.gmra.mxu3 %v1799_v23 }
  0xc5   : > { %v570_v26 = vpop.f32.mrf.mxu0  ;;  %v590_v27 = vpop.f32.mrf.mxu1 }
  0xc6   : > { %v753_v28 = vmul.f32 %v2358_v24, %v570_v26  ;;  %v761_v29 = vmul.f32 %v2358_v24, %v590_v27 }
  0xc8   : > { %v2368_v30 = vadd.f32 %v2363_v25, %v753_v28  ;;  %v2371_v31 = vadd.f32 %v2363_v25, %v761_v29 }
  0xca   : > { %v1746_v32 = vmul.f32 -1.442695, %v2368_v30  ;;  %v1754_v33 = vmul.f32 -1.442695, %v2371_v31 }
  0xcc   : > { %1912 = vpow2.f32 %v1746_v32  ;;  %v610_v34 = vpop.f32.mrf.mxu2  ;;  %v630_v35 = vpop.f32.mrf.mxu3 }
  0xcd   : > { %1914 = vpow2.f32 %v1754_v33  ;;  %v769_v36 = vmul.f32 %v2358_v24, %v610_v34  ;;  %v777_v37 = vmul.f32 %v2358_v24, %v630_v35  ;;  %v572_v38 = vpop.f32.mrf.mxu0  ;;  %v592_v39 = vpop.f32.mrf.mxu1 }
  0xce   : > { %v754_v40 = vmul.f32 %v2358_v24, %v572_v38  ;;  %v762_v41 = vmul.f32 %v2358_v24, %v592_v39 }
  0xcf   : > { %v2380_v42 = vadd.f32 %v2363_v25, %v769_v36  ;;  %v2383_v43 = vadd.f32 %v2363_v25, %v777_v37 }
  0xd0   : > { %v2386_v44 = vadd.f32 %v2363_v25, %v754_v40  ;;  %v2389_v45 = vadd.f32 %v2363_v25, %v762_v41 }
  0xd1   : > { %v1762_v46 = vmul.f32 -1.442695, %v2380_v42  ;;  %v1770_v47 = vmul.f32 -1.442695, %v2383_v43 }
  0xd2   : > { %v1913_v48 = vpop.eup %1912  ;;  %v1747_v51 = vmul.f32 -1.442695, %v2386_v44  ;;  %v1755_v53 = vmul.f32 -1.442695, %v2389_v45 }
  0xd3   : > { %v1915_v49 = vpop.eup %1914  ;;  %v2393_v50 = vadd.f32 1.0, %v1913_v48  ;;  %1916 = vpow2.f32 %v1762_v46 }
  0xd4   : > { %v2396_v52 = vadd.f32 1.0, %v1915_v49  ;;  %1918 = vpow2.f32 %v1770_v47  ;;  %v612_v54 = vpop.f32.mrf.mxu2  ;;  %v632_v56 = vpop.f32.mrf.mxu3 }
  0xd5   : > { %1920 = vrcp.f32 %v2393_v50  ;;  %v770_v55 = vmul.f32 %v2358_v24, %v612_v54  ;;  %v575_v57 = vpop.f32.mrf.mxu0  ;;  %v958_v58 = vand.u32 2147483647, %v2393_v50  ;;  %v960_v59 = vand.u32 2147483648, %v2393_v50  ;;  %v595_v60 = vpop.f32.mrf.mxu1 }
  0xd6   : > { %1922 = vrcp.f32 %v2396_v52  ;;  %v1078_v62 = vand.u32 2147483647, %v2396_v52  ;;  %v1080_v63 = vand.u32 2147483648, %v2396_v52  ;;  %v778_v3 = vmul.f32 %v2358_v24, %v632_v56 }
  0xd7   : > { %1924 = vpow2.f32 %v1747_v51  ;;  %v2407_v0 = vadd.f32 %v2363_v25, %v770_v55  ;;  %v755_v4 = vmul.f32 %v2358_v24, %v575_v57  ;;  %vm954_vm0 = vweird.f32 %v2393_v50 }
  0xd8   : > { %1926 = vpow2.f32 %v1755_v53  ;;  %vm1074_vm1 = vweird.f32 %v2396_v52  ;;  %v763_v7 = vmul.f32 %v2358_v24, %v595_v60  ;;  %vm2419_vm2 = vcmp.eq.f32.partialorder %v958_v58, 8.507059e+37 }
  0xd9   : > { %v1917_v61 = vpop.eup %1916  ;;  %v961_v11 = vor.u32 1.1754944e-38, %v960_v59  ;;  %vm2425_vm3 = vcmp.eq.f32.partialorder %v1078_v62, 8.507059e+37  ;;  %v1081_v15 = vor.u32 1.1754944e-38, %v1080_v63  ;;  %v1763_v16 = vmul.f32 -1.442695, %v2407_v0 }
  0xda   : > { %v1919_v1 = vpop.eup %1918  ;;  %v2409_v2 = vadd.f32 1.0, %v1917_v61  ;;  %v2432_v19 = vadd.f32 %v2363_v25, %v778_v3  ;;  %v2435_v20 = vadd.f32 %v2363_v25, %v755_v4  ;;  %v2439_v23 = vadd.f32 %v2363_v25, %v763_v7 }
  0xdb   : > { %v1921_v5 = vpop.eup %1920  ;;  %v2415_v6 = vadd.f32 1.0, %v1919_v1 }
  0xdc   : > { %v1923_v8 = vpop.eup %1922  ;;  %v950_v9 = vmul.f32 %v1921_v5, %v2393_v50  ;;  %1928 = vrcp.f32 %v2409_v2  ;;  %vm955_vm4 = vweird.f32 %v1921_v5  ;;  %v1198_v22 = vand.u32 2147483647, %v2409_v2 }
  0xdd   : > { %v1925_v12 = vpop.eup %1924  ;;  %v1070_v13 = vmul.f32 %v1923_v8, %v2396_v52  ;;  %1930 = vrcp.f32 %v2415_v6  ;;  %v1200_v27 = vand.u32 2147483648, %v2409_v2  ;;  %vm1075_vm5 = vweird.f32 %v1923_v8  ;;  %vm956_vm7 = vmor %vm954_vm0, %vm955_vm4  ;;  %v597_v53 = vpop.f32.mrf.mxu1 }
  0xde   : > { %v1927_v17 = vpop.eup %1926  ;;  %v951_v18 = vsub.f32 1.0, %v950_v9  ;;  %v2442_v28 = vadd.f32 1.0, %v1925_v12  ;;  %v1318_v33 = vand.u32 2147483647, %v2415_v6  ;;  %1932 = vpow2.f32 %v1763_v16  ;;  %vm1076_vm10 = vmor %vm1074_vm1, %vm1075_vm5 }
  0xdf   : > { %v1071_v21 = vsub.f32 1.0, %v1070_v13  ;;  %v2444_v29 = vadd.f32 1.0, %v1927_v17  ;;  %vm1194_vm6 = vweird.f32 %v2409_v2  ;;  %v1320_v36 = vand.u32 2147483648, %v2415_v6  ;;  %v615_v17 = vpop.f32.mrf.mxu2 }
  0xe0   : > { %v952_v26 = vmul.f32 %v1921_v5, %v951_v18  ;;  %1934 = vrcp.f32 %v2442_v28  ;;  %vm2455_vm8 = vcmp.eq.f32.partialorder %v1198_v22, 8.507059e+37  ;;  %vm1314_vm9 = vweird.f32 %v2415_v6 }
  0xe1   : > { %v1072_v32 = vmul.f32 %v1923_v8, %v1071_v21  ;;  %v1201_v46 = vor.u32 1.1754944e-38, %v1200_v27  ;;  %1936 = vrcp.f32 %v2444_v29  ;;  %v1771_v47 = vmul.f32 -1.442695, %v2432_v19 }
  0xe2   : > { %v1929_v34 = vpop.eup %1928  ;;  %v953_v35 = vadd.f32 %v1921_v5, %v952_v26  ;;  %vm2468_vm11 = vcmp.eq.f32.partialorder %v1318_v33, 8.507059e+37  ;;  %v1321_v55 = vor.u32 1.1754944e-38, %v1320_v36  ;;  %v973_v56 = vand.u32 2147483647, %v2442_v28  ;;  %v577_v33 = vpop.f32.mrf.mxu0 }
  0xe3   : > { %v1073_v37 = vadd.f32 %v1923_v8, %v1072_v32  ;;  %v1190_v38 = vmul.f32 %v1929_v34, %v2409_v2  ;;  %v1931_v40 = vpop.eup %1930  ;;  %vm1195_vm12 = vweird.f32 %v1929_v34  ;;  %vm969_vm13 = vweird.f32 %v2442_v28 }
  0xe4   : > { %v957_v41 = vsel %vm956_vm7, %v1921_v5, %v953_v35  ;;  %v1310_v51 = vmul.f32 %v1931_v40, %v2415_v6  ;;  %v1933_v57 = vpop.eup %1932  ;;  %1938 = vpow2.f32 %v1771_v47  ;;  %vm1315_vm14 = vweird.f32 %v1931_v40  ;;  %vm1196_vm15 = vmor %vm1194_vm6, %vm1195_vm12 }
  0xe5   : > { %v962_v48 = vsel %vm2419_vm2, %v961_v11, %v957_v41  ;;  %v1077_v49 = vsel %vm1076_vm10, %v1923_v8, %v1073_v37  ;;  %v1191_v50 = vsub.f32 1.0, %v1190_v38  ;;  %v2484_v62 = vadd.f32 1.0, %v1933_v57  ;;  %vm1316_vm2 = vmor %vm1314_vm9, %vm1315_vm14 }
  0xe6   : > { %v1429_v52 = vmul.f32 %v962_v48, %v2368_v30  ;;  %v1082_v54 = vsel %vm2425_vm3, %v1081_v15, %v1077_v49  ;;  %v1311_v60 = vsub.f32 1.0, %v1310_v51  ;;  %v1935_v61 = vpop.eup %1934  ;;  %v975_v30 = vand.u32 2147483648, %v2442_v28 }
  0xe7   : > { %v1437_v58 = vmul.f32 %v1082_v54, %v2371_v31  ;;  %v1192_v59 = vmul.f32 %v1929_v34, %v1191_v50  ;;  %v965_v1 = vmul.f32 %v1935_v61, %v2442_v28  ;;  %v1937_v3 = vpop.eup %1936  ;;  %vm2491_vm0 = vcmp.eq.f32.partialorder %v973_v56, 8.507059e+37 }
  0xe8   : > { %1461 = vst [vmem:[%s2479_s8] sm:$0xff] %v1429_v52  ;;  %v1312_v31 = vmul.f32 %v1931_v40, %v1311_v60  ;;  %vm1089_vm1 = vweird.f32 %v2444_v29  ;;  %1940 = vrcp.f32 %v2484_v62  ;;  %v1748_v5 = vmul.f32 -1.442695, %v2435_v20 }
  0xe9   : > { %1469 = vst [vmem:[%s2479_s8 + $0x40] sm:$0xff] %v1437_v58  ;;  %v1193_v63 = vadd.f32 %v1929_v34, %v1192_v59  ;;  %v966_v9 = vsub.f32 1.0, %v965_v1  ;;  %v1085_v10 = vmul.f32 %v1937_v3, %v2444_v29  ;;  %vm970_vm3 = vweird.f32 %v1935_v61 }
  0xea   : > { %v1313_v8 = vadd.f32 %v1931_v40, %v1312_v31  ;;  %v1093_v11 = vand.u32 2147483647, %v2444_v29  ;;  %v1095_v12 = vand.u32 2147483648, %v2444_v29  ;;  %v1939_v18 = vpop.eup %1938  ;;  %v976_v22 = vor.u32 1.1754944e-38, %v975_v30  ;;  %vm971_vm5 = vmor %vm969_vm13, %vm970_vm3 }
  0xeb   : > { %v1197_v7 = vsel %vm1196_vm15, %v1929_v34, %v1193_v63  ;;  %v967_v15 = vmul.f32 %v1935_v61, %v966_v9  ;;  %v1086_v16 = vsub.f32 1.0, %v1085_v10  ;;  %vm1090_vm4 = vweird.f32 %v1937_v3 }
  0xec   : > { %v1202_v2 = vsel %vm2455_vm8, %v1201_v46, %v1197_v7  ;;  %v1317_v14 = vsel %vm1316_vm2, %v1931_v40, %v1313_v8  ;;  %1942 = vpow2.f32 %v1748_v5  ;;  %v2510_v32 = vadd.f32 1.0, %v1939_v18  ;;  %vm1091_vm7 = vmor %vm1089_vm1, %vm1090_vm4 }
  0xed   : > { %v1445_v13 = vmul.f32 %v1202_v2, %v2380_v42  ;;  %v1322_v21 = vsel %vm2468_vm11, %v1321_v55, %v1317_v14  ;;  %v968_v26 = vadd.f32 %v1935_v61, %v967_v15  ;;  %v1087_v27 = vmul.f32 %v1937_v3, %v1086_v16  ;;  %v635_v42 = vpop.f32.mrf.mxu3  ;;  %v617_v2 = vpop.f32.mrf.mxu2 }
  0xee   : > { %v1453_v6 = vmul.f32 %v1322_v21, %v2383_v43  ;;  %v1941_v34 = vpop.eup %1940  ;;  %vm2515_vm6 = vcmp.eq.f32.partialorder %v1093_v11, 8.507059e+37  ;;  %v1096_v36 = vor.u32 1.1754944e-38, %v1095_v12  ;;  %v1756_v37 = vmul.f32 -1.442695, %v2439_v23 }
  0xef   : > { %1477 = vst [vmem:[%s2479_s8 + $0x80] sm:$0xff] %v1445_v13  ;;  %v771_v43 = vmul.f32 %v2358_v24, %v615_v17  ;;  %v972_v38 = vsel %vm971_vm5, %v1935_v61, %v968_v26  ;;  %v1088_v39 = vadd.f32 %v1937_v3, %v1087_v27  ;;  %v1205_v40 = vmul.f32 %v1941_v34, %v2484_v62 }
  0xf0   : > { %1485 = vst [vmem:[%s2479_s8 + $0xc0] sm:$0xff] %v1453_v6  ;;  %v1213_v41 = vand.u32 2147483647, %v2484_v62  ;;  %v977_v28 = vsel %vm2491_vm0, %v976_v22, %v972_v38  ;;  %1944 = vrcp.f32 %v2510_v32  ;;  %v779_v46 = vmul.f32 %v2358_v24, %v635_v42 }
  0xf1   : > { %v756_v47 = vmul.f32 %v2358_v24, %v577_v33  ;;  %v1430_v48 = vmul.f32 %v977_v28, %v2386_v44  ;;  %v1092_v49 = vsel %vm1091_vm7, %v1937_v3, %v1088_v39  ;;  %v1206_v50 = vsub.f32 1.0, %v1205_v40 }
  0xf2   : > { %v1215_v51 = vand.u32 2147483648, %v2484_v62  ;;  %v1943_v52 = vpop.eup %1942  ;;  %v1097_v54 = vsel %vm2515_vm6, %v1096_v36, %v1092_v49  ;;  %vm1209_vm8 = vweird.f32 %v2484_v62  ;;  %1946 = vpow2.f32 %v1756_v37 }
  0xf3   : > { %v2538_v29 = vadd.f32 %v2363_v25, %v771_v43  ;;  %1462 = vst [vmem:[%s2479_s8 + $0x8] sm:$0xff] %v1430_v48  ;;  %v1438_v55 = vmul.f32 %v1097_v54, %v2389_v45  ;;  %v1207_v44 = vmul.f32 %v1941_v34, %v1206_v50  ;;  %vm1210_vm9 = vweird.f32 %v1941_v34  ;;  %v580_v43 = vpop.f32.mrf.mxu0 }
  0xf4   : > { %v2542_v56 = vadd.f32 1.0, %v1943_v52  ;;  %v2546_v58 = vadd.f32 %v2363_v25, %v779_v46  ;;  %v2549_v59 = vadd.f32 %v2363_v25, %v756_v47  ;;  %v764_v60 = vmul.f32 %v2358_v24, %v597_v53  ;;  %vm1211_vm11 = vmor %vm1209_vm8, %vm1210_vm9 }
  0xf5   : > { %v1764_v57 = vmul.f32 -1.442695, %v2538_v29  ;;  %1470 = vst [vmem:[%s2479_s8 + $0x48] sm:$0xff] %v1438_v55  ;;  %v1208_v61 = vadd.f32 %v1941_v34, %v1207_v44  ;;  %vm1214_vm10 = vcmp.eq.f32.partialorder %v1213_v41, 8.507059e+37  ;;  %v1216_v30 = vor.u32 1.1754944e-38, %v1215_v51  ;;  %v637_v6 = vpop.f32.mrf.mxu3  ;;  %v620_v27 = vpop.f32.mrf.mxu2 }
  0xf6   : > { %1948 = vrcp.f32 %v2542_v56  ;;  %v1945_v45 = vpop.eup %1944  ;;  %v1333_v63 = vand.u32 2147483647, %v2510_v32  ;;  %v1772_v31 = vmul.f32 -1.442695, %v2546_v58  ;;  %v1749_v1 = vmul.f32 -1.442695, %v2549_v59 }
  0xf7   : > { %1950 = vpow2.f32 %v1764_v57  ;;  %v1212_v3 = vsel %vm1211_vm11, %v1941_v34, %v1208_v61  ;;  %v1325_v4 = vmul.f32 %v1945_v45, %v2510_v32  ;;  %v1335_v5 = vand.u32 2147483648, %v2510_v32 }
  0xf8   : > { %v988_v7 = vand.u32 2147483647, %v2542_v56  ;;  %v1947_v8 = vpop.eup %1946  ;;  %v1217_v9 = vsel %vm1214_vm10, %v1216_v30, %v1212_v3  ;;  %v990_v62 = vand.u32 2147483648, %v2542_v56  ;;  %1952 = vpow2.f32 %v1772_v31 }
  0xf9   : > { %v2564_v10 = vadd.f32 %v2363_v25, %v764_v60  ;;  %v1446_v11 = vmul.f32 %v1217_v9, %v2407_v0  ;;  %v1326_v12 = vsub.f32 1.0, %v1325_v4  ;;  %v2567_v13 = vadd.f32 1.0, %v1947_v8 }
  0xfa   : > { %1954 = vpow2.f32 %v1749_v1  ;;  %vm1329_vm12 = vweird.f32 %v2510_v32  ;;  %vm1330_vm13 = vweird.f32 %v1945_v45  ;;  %v772_v17 = vmul.f32 %v2358_v24, %v617_v2 }
  0xfb   : > { %v1757_v14 = vmul.f32 -1.442695, %v2564_v10  ;;  %1478 = vst [vmem:[%s2479_s8 + $0x88] sm:$0xff] %v1446_v11  ;;  %v1327_v16 = vmul.f32 %v1945_v45, %v1326_v12  ;;  %1956 = vrcp.f32 %v2567_v13  ;;  %vm2574_vm14 = vcmp.eq.f32.partialorder %v1333_v63, 8.507059e+37  ;;  %vm1331_vm1 = vmor %vm1329_vm12, %vm1330_vm13 }
  0xfc   : > { %v1949_v15 = vpop.eup %1948  ;;  %v1336_v0 = vor.u32 1.1754944e-38, %v1335_v5  ;;  %vm984_vm15 = vweird.f32 %v2542_v56  ;;  %vm2580_vm0 = vcmp.eq.f32.partialorder %v988_v7, 8.507059e+37  ;;  %v991_v42 = vor.u32 1.1754944e-38, %v990_v62 }
  0xfd   : > { %v1951_v18 = vpop.eup %1950  ;;  %v980_v22 = vmul.f32 %v1949_v15, %v2542_v56  ;;  %v1328_v26 = vadd.f32 %v1945_v45, %v1327_v16  ;;  %v1108_v36 = vand.u32 2147483647, %v2567_v13  ;;  %v1110_v37 = vand.u32 2147483648, %v2567_v13 }
  0xfe   : > { %v2584_v33 = vadd.f32 1.0, %v1951_v18  ;;  %v1953_v34 = vpop.eup %1952  ;;  %1958 = vpow2.f32 %v1757_v14  ;;  %v2592_v40 = vadd.f32 %v2363_v25, %v772_v17  ;;  %v780_v41 = vmul.f32 %v2358_v24, %v637_v6 }
  0xff   : > { %v981_v35 = vsub.f32 1.0, %v980_v22  ;;  %v1332_v39 = vsel %vm1331_vm1, %v1945_v45, %v1328_v26  ;;  %vm985_vm2 = vweird.f32 %v1949_v15  ;;  %v2597_v46 = vadd.f32 1.0, %v1953_v34 }
 0x100   : > { %v1955_v38 = vpop.eup %1954  ;;  %1960 = vrcp.f32 %v2584_v33  ;;  %v1337_v32 = vsel %vm2574_vm14, %v1336_v0, %v1332_v39  ;;  %vm1104_vm3 = vweird.f32 %v2567_v13  ;;  %v757_v50 = vmul.f32 %v2358_v24, %v580_v43  ;;  %vm986_vm5 = vmor %vm984_vm15, %vm985_vm2 }
 0x101   : > { %v982_v28 = vmul.f32 %v1949_v15, %v981_v35  ;;  %v1957_v47 = vpop.eup %1956  ;;  %v1454_v48 = vmul.f32 %v1337_v32, %v2432_v19  ;;  %v2601_v49 = vadd.f32 1.0, %v1955_v38  ;;  %vm2605_vm4 = vcmp.eq.f32.partialorder %v1108_v36, 8.507059e+37 }
 0x102   : > { %v1100_v53 = vmul.f32 %v1957_v47, %v2567_v13  ;;  %v1111_v54 = vor.u32 1.1754944e-38, %v1110_v37  ;;  %v1228_v19 = vand.u32 2147483647, %v2584_v33  ;;  %1962 = vrcp.f32 %v2597_v46  ;;  %v600_v13 = vpop.f32.mrf.mxu1 }
 0x103   : > { %v983_v51 = vadd.f32 %v1949_v15, %v982_v28  ;;  %1486 = vst [vmem:[%s2479_s8 + $0xc8] sm:$0xff] %v1454_v48  ;;  %v1765_v55 = vmul.f32 -1.442695, %v2592_v40  ;;  %v2616_v44 = vadd.f32 %v2363_v25, %v780_v41  ;;  %v1230_v30 = vand.u32 2147483648, %v2584_v33 }
 0x104   : > { %v1959_v57 = vpop.eup %1958  ;;  %v1101_v61 = vsub.f32 1.0, %v1100_v53  ;;  %1964 = vrcp.f32 %v2601_v49  ;;  %vm1105_vm6 = vweird.f32 %v1957_v47  ;;  %v1350_v63 = vand.u32 2147483648, %v2597_v46 }
 0x105   : > { %v987_v60 = vsel %vm986_vm5, %v1949_v15, %v983_v51  ;;  %v2624_v31 = vadd.f32 %v2363_v25, %v757_v50  ;;  %v1348_v5 = vand.u32 2147483647, %v2597_v46  ;;  %vm1224_vm7 = vweird.f32 %v2584_v33  ;;  %vm1106_vm10 = vmor %vm1104_vm3, %vm1105_vm6 }
 0x106   : > { %v1961_v45 = vpop.eup %1960  ;;  %v992_v56 = vsel %vm2580_vm0, %v991_v42, %v987_v60  ;;  %v1102_v3 = vmul.f32 %v1957_v47, %v1101_v61  ;;  %vm2630_vm8 = vcmp.eq.f32.partialorder %v1228_v19, 8.507059e+37  ;;  %v2634_v8 = vadd.f32 1.0, %v1959_v57 }
 0x107   : > { %v1431_v1 = vmul.f32 %v992_v56, %v2435_v20  ;;  %v1220_v4 = vmul.f32 %v1961_v45, %v2584_v33  ;;  %1966 = vpow2.f32 %v1765_v55  ;;  %v1231_v2 = vor.u32 1.1754944e-38, %v1230_v30 }
 0x108   : > { %v1103_v9 = vadd.f32 %v1957_v47, %v1102_v3  ;;  %vm1344_vm9 = vweird.f32 %v2597_v46  ;;  %v1963_v20 = vpop.eup %1962  ;;  %v1351_v11 = vor.u32 1.1754944e-38, %v1350_v63  ;;  %vm999_vm11 = vweird.f32 %v2601_v49  ;;  %v582_v3 = vpop.f32.mrf.mxu0 }
 0x109   : > { %1463 = vst [vmem:[%s2479_s8 + $0x10] sm:$0xff] %v1431_v1  ;;  %v1221_v62 = vsub.f32 1.0, %v1220_v4  ;;  %v1003_v12 = vand.u32 2147483647, %v2601_v49  ;;  %1968 = vrcp.f32 %v2634_v8  ;;  %v1773_v14 = vmul.f32 -1.442695, %v2616_v44  ;;  %v640_v1 = vpop.f32.mrf.mxu3 }
 0x10a   : > { %v1965_v15 = vpop.eup %1964  ;;  %v1107_v16 = vsel %vm1106_vm10, %v1957_v47, %v1103_v9  ;;  %vm1225_vm12 = vweird.f32 %v1961_v45  ;;  %v1340_v18 = vmul.f32 %v1963_v20, %v2597_v46  ;;  %vm2646_vm13 = vcmp.eq.f32.partialorder %v1348_v5, 8.507059e+37 }
 0x10b   : > { %v1222_v17 = vmul.f32 %v1961_v45, %v1221_v62  ;;  %v1112_v0 = vsel %vm2605_vm4, %v1111_v54, %v1107_v16  ;;  %v995_v22 = vmul.f32 %v1965_v15, %v2601_v49  ;;  %v1005_v6 = vand.u32 2147483648, %v2601_v49  ;;  %vm1226_vm15 = vmor %vm1224_vm7, %vm1225_vm12 }
 0x10c   : > { %v1750_v26 = vmul.f32 -1.442695, %v2624_v31  ;;  %v1439_v42 = vmul.f32 %v1112_v0, %v2439_v23  ;;  %v1341_v35 = vsub.f32 1.0, %v1340_v18  ;;  %vm1345_vm14 = vweird.f32 %v1963_v20 }
 0x10d   : > { %v1223_v34 = vadd.f32 %v1961_v45, %v1222_v17  ;;  %v1967_v36 = vpop.eup %1966  ;;  %v996_v37 = vsub.f32 1.0, %v995_v22  ;;  %vm1000_vm0 = vweird.f32 %v1965_v15  ;;  %1970 = vpow2.f32 %v1773_v14  ;;  %vm1346_vm2 = vmor %vm1344_vm9, %vm1345_vm14  ;;  %v602_v17 = vpop.f32.mrf.mxu1 }
 0x10e   : > { %v765_v43 = vmul.f32 %v2358_v24, %v600_v13  ;;  %1471 = vst [vmem:[%s2479_s8 + $0x50] sm:$0xff] %v1439_v42  ;;  %v1342_v39 = vmul.f32 %v1963_v20, %v1341_v35  ;;  %v2660_v41 = vadd.f32 1.0, %v1967_v36  ;;  %v773_v23 = vmul.f32 %v2358_v24, %v620_v27  ;;  %vm1001_vm3 = vmor %vm999_vm11, %vm1000_vm0  ;;  %v622_v36 = vpop.f32.mrf.mxu2 }
 0x10f   : > { %v1227_v38 = vsel %vm1226_vm15, %v1961_v45, %v1223_v34  ;;  %v1969_v32 = vpop.eup %1968  ;;  %v997_v47 = vmul.f32 %v1965_v15, %v996_v37  ;;  %1972 = vpow2.f32 %v1750_v26  ;;  %vm2669_vm1 = vcmp.eq.f32.partialorder %v1003_v12, 8.507059e+37 }
 0x110   : > { %v1232_v28 = vsel %vm2630_vm8, %v1231_v2, %v1227_v38  ;;  %v2666_v33 = vadd.f32 %v2363_v25, %v765_v43  ;;  %v1343_v50 = vadd.f32 %v1963_v20, %v1342_v39  ;;  %v1115_v53 = vmul.f32 %v1969_v32, %v2634_v8 }
 0x111   : > { %v1447_v48 = vmul.f32 %v1232_v28, %v2538_v29  ;;  %v998_v52 = vadd.f32 %v1965_v15, %v997_v47  ;;  %v1006_v54 = vor.u32 1.1754944e-38, %v1005_v6  ;;  %v1123_v19 = vand.u32 2147483647, %v2634_v8 }
 0x112   : > { %1974 = vrcp.f32 %v2660_v41  ;;  %v1347_v55 = vsel %vm1346_vm2, %v1963_v20, %v1343_v50  ;;  %v1116_v29 = vsub.f32 1.0, %v1115_v53  ;;  %v1125_v57 = vand.u32 2147483648, %v2634_v8 }
 0x113   : > { %1479 = vst [vmem:[%s2479_s8 + $0x90] sm:$0xff] %v1447_v48  ;;  %v1758_v60 = vmul.f32 -1.442695, %v2666_v33  ;;  %v1971_v61 = vpop.eup %1970  ;;  %v1352_v46 = vsel %vm2646_vm13, %v1351_v11, %v1347_v55  ;;  %v1002_v30 = vsel %vm1001_vm3, %v1965_v15, %v998_v52  ;;  %vm1119_vm4 = vweird.f32 %v2634_v8 }
 0x114   : > { %v2689_v45 = vadd.f32 %v2363_v25, %v773_v23  ;;  %v1455_v56 = vmul.f32 %v1352_v46, %v2546_v58  ;;  %v1007_v49 = vsel %vm2669_vm1, %v1006_v54, %v1002_v30  ;;  %v1117_v63 = vmul.f32 %v1969_v32, %v1116_v29 }
 0x115   : > { %vm1120_vm5 = vweird.f32 %v1969_v32  ;;  %v1973_v4 = vpop.eup %1972  ;;  %v1432_v5 = vmul.f32 %v1007_v49, %v2549_v59  ;;  %v1243_v7 = vand.u32 2147483647, %v2660_v41  ;;  %v2696_v9 = vadd.f32 1.0, %v1971_v61 }
 0x116   : > { %1976 = vpow2.f32 %v1758_v60  ;;  %1487 = vst [vmem:[%s2479_s8 + $0xd0] sm:$0xff] %v1455_v56  ;;  %v1118_v62 = vadd.f32 %v1969_v32, %v1117_v63  ;;  %vm1124_vm6 = vcmp.eq.f32.partialorder %v1123_v19, 8.507059e+37  ;;  %v1126_v58 = vor.u32 1.1754944e-38, %v1125_v57  ;;  %vm1121_vm7 = vmor %vm1119_vm4, %vm1120_vm5  ;;  %v642_v63 = vpop.f32.mrf.mxu3 }
 0x117   : > { %v2699_v2 = vadd.f32 1.0, %v1973_v4  ;;  %1464 = vst [vmem:[%s2479_s8 + $0x18] sm:$0xff] %v1432_v5  ;;  %1978 = vrcp.f32 %v2696_v9  ;;  %v1766_v59 = vmul.f32 -1.442695, %v2689_v45  ;;  %v781_v11 = vmul.f32 %v2358_v24, %v640_v1 }
 0x118   : > { %v1975_v20 = vpop.eup %1974  ;;  %v758_v12 = vmul.f32 %v2358_v24, %v582_v3  ;;  %v1122_v14 = vsel %vm1121_vm7, %v1969_v32, %v1118_v62  ;;  %v1245_v16 = vand.u32 2147483648, %v2660_v41  ;;  %vm1239_vm8 = vweird.f32 %v2660_v41 }
 0x119   : > { %v1235_v15 = vmul.f32 %v1975_v20, %v2660_v41  ;;  %1980 = vrcp.f32 %v2699_v2  ;;  %v1127_v18 = vsel %vm1124_vm6, %v1126_v58, %v1122_v14  ;;  %vm2713_vm9 = vcmp.eq.f32.partialorder %v1243_v7, 8.507059e+37 }
 0x11a   : > { %v1440_v21 = vmul.f32 %v1127_v18, %v2564_v10  ;;  %v1363_v0 = vand.u32 2147483647, %v2696_v9  ;;  %v1365_v22 = vand.u32 2147483648, %v2696_v9  ;;  %1982 = vpow2.f32 %v1766_v59 }
 0x11b   : > { %v1236_v13 = vsub.f32 1.0, %v1235_v15  ;;  %v2721_v26 = vadd.f32 %v2363_v25, %v781_v11  ;;  %v2724_v27 = vadd.f32 %v2363_v25, %v758_v12  ;;  %v766_v42 = vmul.f32 %v2358_v24, %v602_v17 }
 0x11c   : > { %v1977_v6 = vpop.eup %1976  ;;  %1472 = vst [vmem:[%s2479_s8 + $0x58] sm:$0xff] %v1440_v21  ;;  %vm1240_vm10 = vweird.f32 %v1975_v20  ;;  %v1246_v35 = vor.u32 1.1754944e-38, %v1245_v16  ;;  %vm1359_vm11 = vweird.f32 %v2696_v9  ;;  %v1018_v43 = vand.u32 2147483647, %v2699_v2 }
 0x11d   : > { %v1237_v34 = vmul.f32 %v1975_v20, %v1236_v13  ;;  %v2728_v10 = vadd.f32 1.0, %v1977_v6  ;;  %v1979_v37 = vpop.eup %1978  ;;  %v1774_v38 = vmul.f32 -1.442695, %v2721_v26  ;;  %v1751_v39 = vmul.f32 -1.442695, %v2724_v27  ;;  %vm1241_vm13 = vmor %vm1239_vm8, %vm1240_vm10 }
 0x11e   : > { %v1355_v28 = vmul.f32 %v1979_v37, %v2696_v9  ;;  %vm2735_vm12 = vcmp.eq.f32.partialorder %v1363_v0, 8.507059e+37  ;;  %v1366_v48 = vor.u32 1.1754944e-38, %v1365_v22  ;;  %vm1014_vm14 = vweird.f32 %v2699_v2 }
 0x11f   : > { %v1981_v23 = vpop.eup %1980  ;;  %v1238_v32 = vadd.f32 %v1975_v20, %v1237_v34  ;;  %1984 = vrcp.f32 %v2728_v10  ;;  %v2746_v51 = vadd.f32 %v2363_v25, %v766_v42  ;;  %v774_v53 = vmul.f32 %v2358_v24, %v622_v36 }
 0x120   : > { %v1010_v50 = vmul.f32 %v1981_v23, %v2699_v2  ;;  %v1356_v54 = vsub.f32 1.0, %v1355_v28  ;;  %v1020_v19 = vand.u32 2147483648, %v2699_v2  ;;  %1986 = vpow2.f32 %v1774_v38  ;;  %v1983_v55 = vpop.eup %1982  ;;  %v585_v28 = vpop.f32.mrf.mxu0 }
 0x121   : > { %v1242_v52 = vsel %vm1241_vm13, %v1975_v20, %v1238_v32  ;;  %vm2752_vm15 = vcmp.eq.f32.partialorder %v1018_v43, 8.507059e+37  ;;  %1988 = vpow2.f32 %v1751_v39  ;;  %vm1360_vm0 = vweird.f32 %v1979_v37 }
 0x122   : > { %v1247_v41 = vsel %vm2713_vm9, %v1246_v35, %v1242_v52  ;;  %v1011_v29 = vsub.f32 1.0, %v1010_v50  ;;  %v1357_v61 = vmul.f32 %v1979_v37, %v1356_v54  ;;  %v2757_v46 = vadd.f32 1.0, %v1983_v55  ;;  %vm1361_vm3 = vmor %vm1359_vm11, %vm1360_vm0 }
 0x123   : > { %v1448_v60 = vmul.f32 %v1247_v41, %v2592_v40  ;;  %vm1015_vm1 = vweird.f32 %v1981_v23  ;;  %v1759_v56 = vmul.f32 -1.442695, %v2746_v51  ;;  %v2761_v49 = vadd.f32 %v2363_v25, %v774_v53 }
 0x124   : > { %v1012_v30 = vmul.f32 %v1981_v23, %v1011_v29  ;;  %v1358_v3 = vadd.f32 %v1979_v37, %v1357_v61  ;;  %v1021_v4 = vor.u32 1.1754944e-38, %v1020_v19  ;;  %vm1134_vm2 = vweird.f32 %v2728_v10  ;;  %vm1016_vm4 = vmor %vm1014_vm14, %vm1015_vm1 }
 0x125   : > { %v1985_v1 = vpop.eup %1984  ;;  %1480 = vst [vmem:[%s2479_s8 + $0x98] sm:$0xff] %v1448_v60  ;;  %1990 = vrcp.f32 %v2757_v46  ;;  %v1138_v7 = vand.u32 2147483647, %v2728_v10  ;;  %v1140_v62 = vand.u32 2147483648, %v2728_v10  ;;  %v1767_v59 = vmul.f32 -1.442695, %v2761_v49 }
 0x126   : > { %v1013_v40 = vadd.f32 %v1981_v23, %v1012_v30  ;;  %v1130_v5 = vmul.f32 %v1985_v1, %v2728_v10  ;;  %v1987_v58 = vpop.eup %1986  ;;  %v1362_v20 = vsel %vm1361_vm3, %v1979_v37, %v1358_v3  ;;  %1992 = vpow2.f32 %v1759_v56 }
 0x127   : > { %v782_v9 = vmul.f32 %v2358_v24, %v642_v63  ;;  %v1989_v11 = vpop.eup %1988  ;;  %v1367_v12 = vsel %vm2735_vm12, %v1366_v48, %v1362_v20  ;;  %v1258_v16 = vand.u32 2147483647, %v2757_v46  ;;  %v2782_v18 = vadd.f32 1.0, %v1987_v58  ;;  %v605_v63 = vpop.f32.mrf.mxu1  ;;  %v2847_v58 = vld [vmem:[%s3066_s3] ss:$0 sm:$0xff] }
 0x128   : > { %v1017_v14 = vsel %vm1016_vm4, %v1981_v23, %v1013_v40  ;;  %v1131_v15 = vsub.f32 1.0, %v1130_v5  ;;  %v1456_v17 = vmul.f32 %v1367_v12, %v2616_v44  ;;  %v2784_v8 = vadd.f32 1.0, %v1989_v11  ;;  %v625_v11 = vpop.f32.mrf.mxu2 }
 0x129   : > { %v1022_v2 = vsel %vm2752_vm15, %v1021_v4, %v1017_v14  ;;  %vm1135_vm5 = vweird.f32 %v1985_v1  ;;  %1994 = vpow2.f32 %v1767_v59  ;;  %vm2788_vm6 = vcmp.eq.f32.partialorder %v1138_v7, 8.507059e+37  ;;  %v2855_v59 = vld [vmem:[%s3065_s2] ss:$0 sm:$0xff] }
 0x12a   : > { %v1433_v21 = vmul.f32 %v1022_v2, %v2624_v31  ;;  %v1132_v13 = vmul.f32 %v1985_v1, %v1131_v15  ;;  %1488 = vst [vmem:[%s2479_s8 + $0xd8] sm:$0xff] %v1456_v17  ;;  %1996 = vrcp.f32 %v2782_v18  ;;  %v2794_v44 = vadd.f32 %v2363_v25, %v782_v9  ;;  %vm1136_vm7 = vmor %vm1134_vm2, %vm1135_vm5  ;;  %v645_v15 = vpop.f32.mrf.mxu3 }
 0x12b   : > { %v1991_v0 = vpop.eup %1990  ;;  %v1141_v42 = vor.u32 1.1754944e-38, %v1140_v62  ;;  %1998 = vrcp.f32 %v2784_v8  ;;  %vm1254_vm8 = vweird.f32 %v2757_v46  ;;  %vm2802_vm9 = vcmp.eq.f32.partialorder %v1258_v16, 8.507059e+37 }
 0x12c   : > { %1465 = vst [vmem:[%s2479_s8 + $0x20] sm:$0xff] %v1433_v21  ;;  %v1133_v6 = vadd.f32 %v1985_v1, %v1132_v13  ;;  %v1250_v34 = vmul.f32 %v1991_v0, %v2757_v46  ;;  %v1993_v31 = vpop.eup %1992  ;;  %v1260_v25 = vand.u32 2147483648, %v2757_v46  ;;  %v1380_v36 = vand.u32 2147483648, %v2782_v18 }
 0x12d   : > { %v1378_v38 = vand.u32 2147483647, %v2782_v18  ;;  %v2809_v39 = vadd.f32 1.0, %v1993_v31  ;;  %vm1255_vm10 = vweird.f32 %v1991_v0  ;;  %v1033_v23 = vand.u32 2147483647, %v2784_v8 }
 0x12e   : > { %v1137_v37 = vsel %vm1136_vm7, %v1985_v1, %v1133_v6  ;;  %v1251_v43 = vsub.f32 1.0, %v1250_v34  ;;  %v1775_v32 = vmul.f32 -1.442695, %v2794_v44  ;;  %v1035_v53 = vand.u32 2147483648, %v2784_v8  ;;  %vm1256_vm13 = vmor %vm1254_vm8, %vm1255_vm10 }
 0x12f   : > { %v1142_v10 = vsel %vm2788_vm6, %v1141_v42, %v1137_v37  ;;  %v1995_v47 = vpop.eup %1994  ;;  %2000 = vrcp.f32 %v2809_v39  ;;  %v1261_v54 = vor.u32 1.1754944e-38, %v1260_v25  ;;  %vm1374_vm11 = vweird.f32 %v2782_v18 }
 0x130   : > { %v1441_v48 = vmul.f32 %v1142_v10, %v2666_v33  ;;  %v1252_v50 = vmul.f32 %v1991_v0, %v1251_v43  ;;  %v1997_v52 = vpop.eup %1996  ;;  %v1381_v19 = vor.u32 1.1754944e-38, %v1380_v36  ;;  %v2819_v55 = vadd.f32 1.0, %v1995_v47  ;;  %v587_v10 = vpop.f32.mrf.mxu0 }
 0x131   : > { %v1999_v41 = vpop.eup %1998  ;;  %v1370_v57 = vmul.f32 %v1997_v52, %v2782_v18  ;;  %vm2823_vm12 = vcmp.eq.f32.partialorder %v1378_v38, 8.507059e+37  ;;  %2002 = vpow2.f32 %v1775_v32  ;;  %v759_v33 = vmul.f32 %v2358_v24, %v585_v28 }
 0x132   : > { %1473 = vst [vmem:[%s2479_s8 + $0x60] sm:$0xff] %v1441_v48  ;;  %v1253_v29 = vadd.f32 %v1991_v0, %v1252_v50  ;;  %v1025_v61 = vmul.f32 %v1999_v41, %v2784_v8  ;;  %vm1029_vm14 = vweird.f32 %v2784_v8  ;;  %vm2833_vm15 = vcmp.eq.f32.partialorder %v1033_v23, 8.507059e+37 }
 0x133   : > { %v1153_v56 = vand.u32 2147483647, %v2809_v39  ;;  %v1371_v3 = vsub.f32 1.0, %v1370_v57  ;;  %v1036_v4 = vor.u32 1.1754944e-38, %v1035_v53  ;;  %2004 = vrcp.f32 %v2819_v55 }
 0x134   : > { %v1257_v1 = vsel %vm1256_vm13, %v1991_v0, %v1253_v29  ;;  %vm1375_vm0 = vweird.f32 %v1997_v52  ;;  %v1026_v46 = vsub.f32 1.0, %v1025_v61  ;;  %vm1149_vm1 = vweird.f32 %v2809_v39  ;;  %v627_v61 = vpop.f32.mrf.mxu2 }
 0x135   : > { %v1262_v24 = vsel %vm2802_vm9, %v1261_v54, %v1257_v1  ;;  %v1155_v40 = vand.u32 2147483648, %v2809_v39  ;;  %v2001_v5 = vpop.eup %2000  ;;  %v1372_v62 = vmul.f32 %v1997_v52, %v1371_v3  ;;  %v2850_v20 = vadd.f32 %v2847_v58, %v759_v33  ;;  %vm1376_vm5 = vmor %vm1374_vm11, %vm1375_vm0  ;;  %v607_v54 = vpop.f32.mrf.mxu1 }
 0x136   : > { %v1449_v7 = vmul.f32 %v1262_v24, %v2689_v45  ;;  %v767_v9 = vmul.f32 %v2855_v59, %v605_v63  ;;  %v1027_v12 = vmul.f32 %v1999_v41, %v1026_v46  ;;  %vm1030_vm2 = vweird.f32 %v1999_v41 }
 0x137   : > { %v1145_v45 = vmul.f32 %v2001_v5, %v2809_v39  ;;  %vm2859_vm3 = vcmp.eq.f32.partialorder %v1153_v56, 8.507059e+37  ;;  %v2003_v16 = vpop.eup %2002  ;;  %v1373_v17 = vadd.f32 %v1997_v52, %v1372_v62  ;;  %vm1150_vm4 = vweird.f32 %v2001_v5  ;;  %vm1031_vm6 = vmor %vm1029_vm14, %vm1030_vm2 }
 0x138   : > { %1481 = vst [vmem:[%s2479_s8 + $0xa0] sm:$0xff] %v1449_v7  ;;  %v1752_v2 = vmul.f32 -1.442695, %v2850_v20  ;;  %v2866_v21 = vadd.f32 %v2847_v58, %v767_v9  ;;  %v1028_v13 = vadd.f32 %v1999_v41, %v1027_v12  ;;  %v2871_v22 = vadd.f32 1.0, %v2003_v16  ;;  %vm1151_vm7 = vmor %vm1149_vm1, %vm1150_vm4 }
 0x139   : > { %v1146_v0 = vsub.f32 1.0, %v1145_v45  ;;  %v775_v6 = vmul.f32 %v2855_v59, %v625_v11  ;;  %v2005_v42 = vpop.eup %2004  ;;  %v1377_v34 = vsel %vm1376_vm5, %v1997_v52, %v1373_v17  ;;  %v783_v35 = vmul.f32 %v2855_v59, %v645_v15 }
 0x13a   : > { %2006 = vpow2.f32 %v1752_v2  ;;  %v1760_v31 = vmul.f32 -1.442695, %v2866_v21  ;;  %v1382_v18 = vsel %vm2823_vm12, %v1381_v19, %v1377_v34  ;;  %v1032_v25 = vsel %vm1031_vm6, %v1999_v41, %v1028_v13 }
 0x13b   : > { %v1147_v36 = vmul.f32 %v2001_v5, %v1146_v0  ;;  %v1265_v37 = vmul.f32 %v2005_v42, %v2819_v55  ;;  %v1457_v43 = vmul.f32 %v1382_v18, %v2721_v26  ;;  %v1037_v8 = vsel %vm2833_vm15, %v1036_v4, %v1032_v25  ;;  %v647_v0 = vpop.f32.mrf.mxu3 }
 0x13c   : > { %v1156_v38 = vor.u32 1.1754944e-38, %v1155_v40  ;;  %2008 = vrcp.f32 %v2871_v22  ;;  %v1434_v23 = vmul.f32 %v1037_v8, %v2724_v27  ;;  %v1273_v47 = vand.u32 2147483647, %v2819_v55 }
 0x13d   : > { %v1148_v32 = vadd.f32 %v2001_v5, %v1147_v36  ;;  %v1266_v28 = vsub.f32 1.0, %v1265_v37  ;;  %1489 = vst [vmem:[%s2479_s8 + $0xe0] sm:$0xff] %v1457_v43  ;;  %vm1270_vm8 = vweird.f32 %v2005_v42  ;;  %v1275_v26 = vand.u32 2147483648, %v2819_v55 }
 0x13e   : > { %2010 = vpow2.f32 %v1760_v31  ;;  %v2894_v48 = vadd.f32 %v2847_v58, %v775_v6  ;;  %1466 = vst [vmem:[%s2479_s8 + $0x28] sm:$0xff] %v1434_v23  ;;  %v2898_v27 = vadd.f32 %v2847_v58, %v783_v35  ;;  %v760_v52 = vmul.f32 %v2855_v59, %v587_v10 }
 0x13f   : > { %v1152_v50 = vsel %vm1151_vm7, %v2001_v5, %v1148_v32  ;;  %v1267_v53 = vmul.f32 %v2005_v42, %v1266_v28  ;;  %vm1269_vm9 = vweird.f32 %v2819_v55  ;;  %v1276_v56 = vor.u32 1.1754944e-38, %v1275_v26 }
 0x140   : > { %v2007_v19 = vpop.eup %2006  ;;  %v1157_v39 = vsel %vm2859_vm3, %v1156_v38, %v1152_v50  ;;  %v1768_v41 = vmul.f32 -1.442695, %v2894_v48  ;;  %v1776_v33 = vmul.f32 -1.442695, %v2898_v27  ;;  %vm1271_vm10 = vmor %vm1269_vm9, %vm1270_vm8  ;;  %v2911_v63 = vadd.f32 %v2847_v58, %v760_v52 }
 0x141   : > { %v1442_v29 = vmul.f32 %v1157_v39, %v2746_v51  ;;  %v1268_v57 = vadd.f32 %v2005_v42, %v1267_v53  ;;  %v2906_v60 = vadd.f32 1.0, %v2007_v19  ;;  %v768_v55 = vmul.f32 %v2855_v59, %v607_v54 }
 0x142   : > { %v2009_v30 = vpop.eup %2008  ;;  %2012 = vpow2.f32 %v1768_v41  ;;  %vm1274_vm11 = vcmp.eq.f32.partialorder %v1273_v47, 8.507059e+37  ;;  %v776_v24 = vmul.f32 %v2855_v59, %v627_v61  ;;  %v1395_v7 = vand.u32 2147483648, %v2871_v22 }
 0x143   : > { %1474 = vst [vmem:[%s2479_s8 + $0x68] sm:$0xff] %v1442_v29  ;;  %v1272_v1 = vsel %vm1271_vm10, %v2005_v42, %v1268_v57  ;;  %v1385_v51 = vmul.f32 %v2009_v30, %v2871_v22  ;;  %2014 = vrcp.f32 %v2906_v60  ;;  %v1753_v62 = vmul.f32 -1.442695, %v2911_v63 }
 0x144   : > { %v2011_v3 = vpop.eup %2010  ;;  %v1277_v4 = vsel %vm1274_vm11, %v1276_v56, %v1272_v1  ;;  %2016 = vpow2.f32 %v1776_v33  ;;  %v2924_v9 = vadd.f32 %v2847_v58, %v768_v55  ;;  %vm1390_vm12 = vweird.f32 %v2009_v30 }
 0x145   : > { %v1450_v46 = vmul.f32 %v1277_v4, %v2761_v49  ;;  %v1386_v40 = vsub.f32 1.0, %v1385_v51  ;;  %v2919_v5 = vadd.f32 1.0, %v2011_v3  ;;  %v1393_v12 = vand.u32 2147483647, %v2871_v22 }
 0x146   : > { %v1761_v49 = vmul.f32 -1.442695, %v2924_v9  ;;  %vm1389_vm13 = vweird.f32 %v2871_v22  ;;  %v2934_v17 = vadd.f32 %v2847_v58, %v776_v24  ;;  %v1396_v2 = vor.u32 1.1754944e-38, %v1395_v7 }
 0x147   : > { %1482 = vst [vmem:[%s2479_s8 + $0xa8] sm:$0xff] %v1450_v46  ;;  %v1387_v11 = vmul.f32 %v2009_v30, %v1386_v40  ;;  %2018 = vrcp.f32 %v2919_v5  ;;  %vm1391_vm14 = vmor %vm1389_vm13, %vm1390_vm12  ;;  %vm1394_vm15 = vcmp.eq.f32.partialorder %v1393_v12, 8.507059e+37  ;;  %v1048_v34 = vand.u32 2147483647, %v2906_v60 }
 0x148   : > { %v2013_v45 = vpop.eup %2012  ;;  %2020 = vpow2.f32 %v1753_v62  ;;  %v1050_v36 = vand.u32 2147483648, %v2906_v60  ;;  %v1769_v37 = vmul.f32 -1.442695, %v2934_v17  ;;  %v784_v43 = vmul.f32 %v2855_v59, %v647_v0 }
 0x149   : > { %v2015_v14 = vpop.eup %2014  ;;  %v1388_v15 = vadd.f32 %v2009_v30, %v1387_v11  ;;  %v2931_v16 = vadd.f32 1.0, %v2013_v45  ;;  %2022 = vpow2.f32 %v1761_v49  ;;  %vm1044_vm0 = vweird.f32 %v2906_v60 }
 0x14a   : > { %v1040_v13 = vmul.f32 %v2015_v14, %v2906_v60  ;;  %v2017_v6 = vpop.eup %2016  ;;  %vm1045_vm1 = vweird.f32 %v2015_v14  ;;  %vm2948_vm2 = vcmp.eq.f32.partialorder %v1048_v34, 8.507059e+37  ;;  %v1170_v32 = vand.u32 2147483648, %v2919_v5 }
 0x14b   : > { %v1392_v42 = vsel %vm1391_vm14, %v2009_v30, %v1388_v15  ;;  %2024 = vrcp.f32 %v2931_v16  ;;  %v2939_v35 = vadd.f32 1.0, %v2017_v6  ;;  %vm1046_vm3 = vmor %vm1044_vm0, %vm1045_vm1  ;;  %v1051_v53 = vor.u32 1.1754944e-38, %v1050_v36 }
 0x14c   : > { %v1397_v22 = vsel %vm1394_vm15, %v1396_v2, %v1392_v42  ;;  %v1041_v31 = vsub.f32 1.0, %v1040_v13  ;;  %vm1164_vm4 = vweird.f32 %v2919_v5  ;;  %v2961_v54 = vadd.f32 %v2847_v58, %v784_v43 }
 0x14d   : > { %v2019_v18 = vpop.eup %2018  ;;  %v1458_v25 = vmul.f32 %v1397_v22, %v2794_v44  ;;  %v1168_v44 = vand.u32 2147483647, %v2919_v5  ;;  %2026 = vrcp.f32 %v2939_v35  ;;  %v1171_v58 = vor.u32 1.1754944e-38, %v1170_v32 }
 0x14e   : > { %v2021_v8 = vpop.eup %2020  ;;  %v1042_v38 = vmul.f32 %v2015_v14, %v1041_v31  ;;  %v1160_v10 = vmul.f32 %v2019_v18, %v2919_v5  ;;  %2028 = vpow2.f32 %v1769_v37  ;;  %vm1165_vm5 = vweird.f32 %v2019_v18 }
 0x14f   : > { %1490 = vst [vmem:[%s2479_s8 + $0xe8] sm:$0xff] %v1458_v25  ;;  %v2023_v28 = vpop.eup %2022  ;;  %v2955_v26 = vadd.f32 1.0, %v2021_v8  ;;  %vm2966_vm6 = vcmp.eq.f32.partialorder %v1168_v44, 8.507059e+37  ;;  %vm1166_vm7 = vmor %vm1164_vm4, %vm1165_vm5  ;;  %v1288_v56 = vand.u32 2147483647, %v2931_v16  ;;  %v1290_v55 = vand.u32 2147483648, %v2931_v16 }
 0x150   : > { %v1043_v59 = vadd.f32 %v2015_v14, %v1042_v38  ;;  %v1161_v47 = vsub.f32 1.0, %v1160_v10  ;;  %v2958_v52 = vadd.f32 1.0, %v2023_v28  ;;  %v1777_v1 = vmul.f32 -1.442695, %v2961_v54 }
 0x151   : > { %v2025_v50 = vpop.eup %2024  ;;  %2030 = vrcp.f32 %v2955_v26  ;;  %vm1284_vm9 = vweird.f32 %v2931_v16  ;;  %v1408_v46 = vand.u32 2147483647, %v2939_v35  ;;  %vm1289_vm11 = vcmp.eq.f32.partialorder %v1288_v56, 8.507059e+37 }
 0x152   : > { %v1047_v19 = vsel %vm1046_vm3, %v2015_v14, %v1043_v59  ;;  %v1162_v39 = vmul.f32 %v2019_v18, %v1161_v47  ;;  %v1280_v41 = vmul.f32 %v2025_v50, %v2931_v16  ;;  %2032 = vrcp.f32 %v2958_v52 }
 0x153   : > { %v1052_v29 = vsel %vm2948_vm2, %v1051_v53, %v1047_v19  ;;  %v2027_v30 = vpop.eup %2026  ;;  %vm1285_vm8 = vweird.f32 %v2025_v50  ;;  %v1291_v12 = vor.u32 1.1754944e-38, %v1290_v55  ;;  %v1410_v45 = vand.u32 2147483648, %v2939_v35 }
 0x154   : > { %v1435_v60 = vmul.f32 %v1052_v29, %v2850_v20  ;;  %v1163_v33 = vadd.f32 %v2019_v18, %v1162_v39  ;;  %v1281_v61 = vsub.f32 1.0, %v1280_v41  ;;  %v2029_v51 = vpop.eup %2028  ;;  %v1400_v20 = vmul.f32 %v2027_v30, %v2939_v35  ;;  %vm1286_vm10 = vmor %vm1284_vm9, %vm1285_vm8 }
 0x155   : > { %v2985_v62 = vadd.f32 1.0, %v2029_v51  ;;  %2034 = vpow2.f32 %v1777_v1  ;;  %vm1405_vm12 = vweird.f32 %v2027_v30  ;;  %vm1404_vm13 = vweird.f32 %v2939_v35 }
 0x156   : > { %1467 = vst [vmem:[%s2479_s8 + $0x30] sm:$0xff] %v1435_v60  ;;  %v1167_v3 = vsel %vm1166_vm7, %v2019_v18, %v1163_v33  ;;  %v1282_v4 = vmul.f32 %v2025_v50, %v1281_v61  ;;  %v1401_v7 = vsub.f32 1.0, %v1400_v20  ;;  %vm2991_vm14 = vcmp.eq.f32.partialorder %v1408_v46, 8.507059e+37  ;;  %vm1406_vm15 = vmor %vm1404_vm13, %vm1405_vm12 }
 0x157   : > { %v1172_v24 = vsel %vm2966_vm6, %v1171_v58, %v1167_v3  ;;  %v2031_v11 = vpop.eup %2030  ;;  %2036 = vrcp.f32 %v2985_v62  ;;  %v1411_v34 = vor.u32 1.1754944e-38, %v1410_v45  ;;  %vm1059_vm0 = vweird.f32 %v2955_v26 }
 0x158   : > { %v1443_v40 = vmul.f32 %v1172_v24, %v2866_v21  ;;  %v1283_v5 = vadd.f32 %v2025_v50, %v1282_v4  ;;  %v1402_v14 = vmul.f32 %v2027_v30, %v1401_v7  ;;  %v1055_v15 = vmul.f32 %v2031_v11, %v2955_v26  ;;  %v2033_v16 = vpop.eup %2032 }
 0x159   : > { %v1175_v42 = vmul.f32 %v2033_v16, %v2958_v52  ;;  %v1063_v22 = vand.u32 2147483647, %v2955_v26  ;;  %v1065_v31 = vand.u32 2147483648, %v2955_v26  ;;  %vm1060_vm1 = vweird.f32 %v2031_v11 }
 0x15a   : > { %1475 = vst [vmem:[%s2479_s8 + $0x70] sm:$0xff] %v1443_v40  ;;  %v1287_v49 = vsel %vm1286_vm10, %v2025_v50, %v1283_v5  ;;  %v1403_v0 = vadd.f32 %v2027_v30, %v1402_v14  ;;  %v1056_v6 = vsub.f32 1.0, %v1055_v15  ;;  %vm1180_vm2 = vweird.f32 %v2033_v16  ;;  %vm1061_vm3 = vmor %vm1059_vm0, %vm1060_vm1 }
 0x15b   : > { %v1292_v21 = vsel %vm1289_vm11, %v1291_v12, %v1287_v49  ;;  %v1176_v25 = vsub.f32 1.0, %v1175_v42  ;;  %v2035_v36 = vpop.eup %2034  ;;  %v1183_v37 = vand.u32 2147483647, %v2958_v52  ;;  %v1185_v43 = vand.u32 2147483648, %v2958_v52 }
 0x15c   : > { %v1451_v13 = vmul.f32 %v1292_v21, %v2894_v48  ;;  %v1407_v35 = vsel %vm1406_vm15, %v2027_v30, %v1403_v0  ;;  %v1057_v18 = vmul.f32 %v2031_v11, %v1056_v6  ;;  %v948_v23 = vadd.f32 1.0, %v2035_v36 }
 0x15d   : > { %v1412_v48 = vsel %vm2991_vm14, %v1411_v34, %v1407_v35  ;;  %v1177_v10 = vmul.f32 %v2033_v16, %v1176_v25  ;;  %v2037_v44 = vpop.eup %2036  ;;  %vm1064_vm4 = vcmp.eq.f32.partialorder %v1063_v22, 8.507059e+37  ;;  %v1066_v32 = vor.u32 1.1754944e-38, %v1065_v31 }
 0x15e   : > { %1483 = vst [vmem:[%s2479_s8 + $0xb0] sm:$0xff] %v1451_v13  ;;  %v1459_v8 = vmul.f32 %v1412_v48, %v2898_v27  ;;  %v1058_v38 = vadd.f32 %v2031_v11, %v1057_v18  ;;  %vm1179_vm5 = vweird.f32 %v2958_v52  ;;  %v1295_v47 = vmul.f32 %v2037_v44, %v2985_v62 }
 0x15f   : > { %v1178_v59 = vadd.f32 %v2033_v16, %v1177_v10  ;;  %vm1181_vm6 = vmor %vm1179_vm5, %vm1180_vm2  ;;  %v1186_v27 = vor.u32 1.1754944e-38, %v1185_v43  ;;  %2038 = vrcp.f32 %v948_v23  ;;  %vm1184_vm7 = vcmp.eq.f32.partialorder %v1183_v37, 8.507059e+37 }
 0x160   : > { %1491 = vst [vmem:[%s2479_s8 + $0xf0] sm:$0xff] %v1459_v8  ;;  %v1062_v28 = vsel %vm1061_vm3, %v2031_v11, %v1058_v38  ;;  %v1296_v19 = vsub.f32 1.0, %v1295_v47  ;;  %v1305_v41 = vand.u32 2147483648, %v2985_v62  ;;  %vm1300_vm8 = vweird.f32 %v2037_v44 }
 0x161   : > { %v1067_v50 = vsel %vm1064_vm4, %v1066_v32, %v1062_v28  ;;  %v1182_v26 = vsel %vm1181_vm6, %v2033_v16, %v1178_v59  ;;  %v1303_v57 = vand.u32 2147483647, %v2985_v62  ;;  %vm1299_vm9 = vweird.f32 %v2985_v62 }
 0x162   : > { %v1436_v53 = vmul.f32 %v1067_v50, %v2911_v63  ;;  %v1187_v39 = vsel %vm1184_vm7, %v1186_v27, %v1182_v26  ;;  %v1297_v29 = vmul.f32 %v2037_v44, %v1296_v19  ;;  %vm1301_vm10 = vmor %vm1299_vm9, %vm1300_vm8  ;;  %v1306_v33 = vor.u32 1.1754944e-38, %v1305_v41 }
 0x163   : > { %v1444_v52 = vmul.f32 %v1187_v39, %v2924_v9  ;;  %vm1304_vm11 = vcmp.eq.f32.partialorder %v1303_v57, 8.507059e+37  ;;  %v1425_v55 = vand.u32 2147483648, %v948_v23  ;;  %v1423_v51 = vand.u32 2147483647, %v948_v23 }
 0x164   : > { %1468 = vst [vmem:[%s2479_s8 + $0x38] sm:$0xff] %v1436_v53  ;;  %v1298_v60 = vadd.f32 %v2037_v44, %v1297_v29  ;;  %vm1419_vm13 = vweird.f32 %v948_v23 }
 0x165   : > { %1476 = vst [vmem:[%s2479_s8 + $0x78] sm:$0xff] %v1444_v52  ;;  %v2039_v63 = vpop.eup %2038  ;;  %v1426_v4 = vor.u32 1.1754944e-38, %v1425_v55  ;;  %vm1424_vm15 = vcmp.eq.f32.partialorder %v1423_v51, 8.507059e+37 }
 0x166   : > { %v1302_v58 = vsel %vm1301_vm10, %v2037_v44, %v1298_v60  ;;  %v1415_v61 = vmul.f32 %v2039_v63, %v948_v23  ;;  %vm1420_vm12 = vweird.f32 %v2039_v63 }
 0x167   : > { %v1307_v30 = vsel %vm1304_vm11, %v1306_v33, %v1302_v58  ;;  %vm1421_vm14 = vmor %vm1419_vm13, %vm1420_vm12 }
 0x168   : > { %v1452_v9 = vmul.f32 %v1307_v30, %v2934_v17  ;;  %v1416_v56 = vsub.f32 1.0, %v1415_v61 }
 0x16a   : > { %1484 = vst [vmem:[%s2479_s8 + $0xb8] sm:$0xff] %v1452_v9  ;;  %v1417_v1 = vmul.f32 %v2039_v63, %v1416_v56 }
 0x16c   : > { %v1418_v3 = vadd.f32 %v2039_v63, %v1417_v1 }
 0x16e   : > { %v1422_v17 = vsel %vm1421_vm14, %v2039_v63, %v1418_v3 }
 0x16f   : > { %v1427_v20 = vsel %vm1424_vm15, %v1426_v4, %v1422_v17 }
 0x170   : > { %v1460_v24 = vmul.f32 %v1427_v20, %v2961_v54 }
 0x172   : > { %1492 = vst [vmem:[%s2479_s8 + $0xf8] sm:$0xff] %v1460_v24 }
 0x173   : > { %2129 = shalt.err (!%p2126_p0)
}
 0x174   : > { %s2193_s10 = smov 128   ;;  %s2194_s8 = smov 8  }
 0x175   : > { %1839 = dma.vmem_to_hbm [thread:$0]  (%p2302_p5), %s1508_s13, 4096, %s1510_s18, %s1494_s21, %s2193_s10, %s2193_s10, %s2194_s8  }
 0x176 PF: > { %s1524_s11 = sand.u32 1, %s2168_s15   ;;  %p1850_p3 = pnand %p1642_p11, %p2269_p6 }
 0x177   : > { %s1525_s14 = scalar_lea.sflag [#allocation5], %s1524_s11 }
 0x178   : > { %p1851_p7 = pneg %p1850_p3 }
 0x17a   : > { %2163 = dma.done.wait (%p1851_p7), %s1525_s14, 4096  }
 0x17b   : > { %2165 = vsyncadd (%p1851_p7), %s1525_s14, 4294963200  ;;  %s21_s20 = sadd.s32 1, %s2188_s20   ;;  %s3129_s12 = sld [smem:[#allocation12_spill]] }
 0x17c   : > { %p18_p9 = scmp.ge.s32.totalorder %s21_s20, 4   ;;  %s3130_s15 = smov %s2172_s16 }
 0x17d   : > { %s3131_s16 = smov %s2176_s17  ;;  %s3132_s17 = smov %s2311_s22 }
 0x17e   : > { %s3133_s18 = smov %s2184_s19  ;;  %20 = sbr.rel (!%p18_p9) target bundleno = 9 (0x9), region = 100 }
 0x181   : > { %s3134_s19 = smov %s3129_s12 }
 0x183   :  { %1531 = vsyncpa [#allocation4], 1 }
 0x184   :  { %1533 = vsyncpa [#allocation4 + $0x1], 1 }
 0x185   :  { %1534 = vsyncpa [#allocation7], 1 }
 0x186   :  { %1535 = vsyncpa [#allocation5], 1 }
 0x187   :  { %1537 = vsyncpa [#allocation5 + $0x1], 1 }

</bundles_post_ra>
